<compile_context>
chip_gen: v7x
topology: tpu7x:2x2x1
jax: 0.10.0
libtpu: 0.0.40
codegen_flags: <defaults>
</compile_context>

<pallas_src>
import jax
import jax.numpy as jnp
from jax import lax
from jax.experimental import pallas as pl
from jax.experimental.pallas import tpu as pltpu


def _round_up(x, m):
    return (x + m - 1) // m * m


# -----------------------------------------------------------------------------
# Kernel A: weight = ELU(_weight) + 1   (elementwise, computed once, f32 math)
# -----------------------------------------------------------------------------
def _elu_plus_one_kernel(w_ref, o_ref):
    w = w_ref[...].astype(jnp.float32)
    # ELU(alpha=1): w if w > 0 else exp(w) - 1 ; then +1.
    o_ref[...] = (jnp.where(w > 0, w, jnp.exp(w) - 1.0) + 1.0).astype(o_ref.dtype)


def _transform_weight(w_pad, tn, tk, out_dtype):
    n_p, k_p = w_pad.shape
    return pl.pallas_call(
        _elu_plus_one_kernel,
        out_shape=jax.ShapeDtypeStruct((n_p, k_p), out_dtype),
        grid_spec=pltpu.PrefetchScalarGridSpec(
            num_scalar_prefetch=0,
            grid=(n_p // tn, k_p // tk),
            in_specs=[pl.BlockSpec((tn, tk), lambda i, j: (i, j))],
            out_specs=pl.BlockSpec((tn, tk), lambda i, j: (i, j)),
        ),
        compiler_params=pltpu.CompilerParams(
            dimension_semantics=("parallel", "parallel")),
    )(w_pad)


# -----------------------------------------------------------------------------
# Kernel B: tiled  out = x @ w.T  with (d_out, d_in) weight, f32 accumulation
# -----------------------------------------------------------------------------
def _matmul_nt_kernel(x_ref, w_ref, o_ref, acc_ref):
    @pl.when(pl.program_id(2) == 0)
    def _():
        acc_ref[...] = jnp.zeros_like(acc_ref)

    # Contract x's K (dim 1) with the weight's K (dim 1): no transpose needed.
    acc_ref[...] += lax.dot_general(
        x_ref[...], w_ref[...],
        dimension_numbers=(((1,), (1,)), ((), ())),
        preferred_element_type=jnp.float32)

    @pl.when(pl.program_id(2) == pl.num_programs(2) - 1)
    def _():
        o_ref[...] = acc_ref[...].astype(o_ref.dtype)


def _matmul_nt(x_pad, w_pad, tm, tn, tk, out_dtype):
    m_p, k_p = x_pad.shape
    n_p, _ = w_pad.shape
    return pl.pallas_call(
        _matmul_nt_kernel,
        out_shape=jax.ShapeDtypeStruct((m_p, n_p), out_dtype),
        grid_spec=pltpu.PrefetchScalarGridSpec(
            num_scalar_prefetch=0,
            grid=(m_p // tm, n_p // tn, k_p // tk),
            in_specs=[
                pl.BlockSpec((tm, tk), lambda i, j, k: (i, k)),
                pl.BlockSpec((tn, tk), lambda i, j, k: (j, k)),
            ],
            out_specs=pl.BlockSpec((tm, tn), lambda i, j, k: (i, j)),
            scratch_shapes=[pltpu.VMEM((tm, tn), jnp.float32)],
        ),
        compiler_params=pltpu.CompilerParams(
            dimension_semantics=("parallel", "parallel", "arbitrary")),
    )(x_pad, w_pad)


def nonneg_linear_forward(x, weight_raw, *, compute_dtype=jnp.bfloat16,
                          tm=256, tn=256, tk=512):
    """forward(x) = x @ (ELU(weight_raw) + 1).T

    x: (..., d_in), weight_raw: (d_out, d_in). Returns (..., d_out) in x.dtype.
    """
    *lead, d_in = x.shape
    d_out, d_in_w = weight_raw.shape
    assert d_in == d_in_w

    x2 = x.reshape(-1, d_in)
    m = x2.shape[0]

    # Shrink tiles for small problems; keep (16, 128) layout granules so blocks
    # satisfy TPU tiling for bf16 operands and the f32 output stays lane-dense.
    tm = min(tm, _round_up(m, 16))
    tn = min(tn, _round_up(d_out, 128))
    tk = min(tk, _round_up(d_in, 128))

    m_p = _round_up(m, tm)
    n_p = _round_up(d_out, tn)
    k_p = _round_up(d_in, tk)

    x_pad = jnp.pad(x2.astype(compute_dtype), ((0, m_p - m), (0, k_p - d_in)))
    w_pad = jnp.pad(weight_raw, ((0, n_p - d_out), (0, k_p - d_in)))

    # One-time ELU(w)+1 (hoisted out of the matmul grid), emitted in bf16.
    w_t = _transform_weight(w_pad, tn, tk, compute_dtype)

    out_pad = _matmul_nt(x_pad, w_t, tm, tn, tk, jnp.float32)
    out = out_pad[:m, :d_out].astype(x.dtype)
    return out.reshape(*lead, d_out)


if __name__ == "__main__":
    key = jax.random.PRNGKey(0)
    k_w, k_x = jax.random.split(key, 2)

    # Module-consistent small shapes: d_in=32, d_out=16, x = (batch=2, seq=8, d_in).
    d_in, d_out = 32, 16
    batch, seq = 2, 8

    # __init__: _weight = randn(d_out, d_in) - 3 ; bias path not implemented (matches module).
    weight_raw = jax.random.normal(k_w, (d_out, d_in), dtype=jnp.float32) - 3.0
    x = jax.random.normal(k_x, (batch, seq, d_in), dtype=jnp.float32)

    out = nonneg_linear_forward(x, weight_raw)
    out = jax.block_until_ready(out)

    # Pure-JAX f32 reference of the forward semantics.
    w_ref = jnp.where(weight_raw > 0, weight_raw, jnp.exp(weight_raw) - 1.0) + 1.0
    ref = jnp.einsum("bsk,nk->bsn", x, w_ref)

    assert out.shape == (batch, seq, d_out)
    # bf16 MXU operands with f32 accumulation -> relaxed tolerance vs f32 reference.
    assert jnp.allclose(out, ref, atol=1e-2, rtol=2e-2), "mismatch vs reference"

    print("KERNEL_OK")
</pallas_src>

<mosaic_0001>
module attributes {stable_mosaic.version = 11 : i64} {
  func.func @_elu_plus_one_kernel(%arg0: i32, %arg1: i32, %arg2: memref<128x128xf32, #tpu.memory_space<vmem>>, %arg3: memref<128x128xbf16, #tpu.memory_space<vmem>>) attributes {dimension_semantics = [#tpu.dimension_semantics<parallel>, #tpu.dimension_semantics<parallel>], iteration_bounds = array<i64: 1, 1>, scalar_prefetch = 0 : i64, scratch_operands = 0 : i64, tpu.core_type = #tpu.core_type<tc>, window_params = [{transform_indices = @transform_0, window_bounds = array<i64: 128, 128>}, {transform_indices = @transform_1, window_bounds = array<i64: 128, 128>}]} {
    %c0 = arith.constant 0 : index
    %c0_0 = arith.constant 0 : index
    %0 = vector.load %arg2[%c0, %c0_0] : memref<128x128xf32, #tpu.memory_space<vmem>>, vector<128x128xf32>
    %cst = arith.constant 0.000000e+00 : f32
    %1 = vector.broadcast %cst : f32 to vector<128x128xf32>
    %2 = arith.cmpf ogt, %0, %1 : vector<128x128xf32>
    %3 = math.exp %0 : vector<128x128xf32>
    %cst_1 = arith.constant 1.000000e+00 : f32
    %4 = vector.broadcast %cst_1 : f32 to vector<128x128xf32>
    %5 = arith.subf %3, %4 : vector<128x128xf32>
    %6 = arith.select %2, %0, %5 : vector<128x128xi1>, vector<128x128xf32>
    %cst_2 = arith.constant 1.000000e+00 : f32
    %7 = vector.broadcast %cst_2 : f32 to vector<128x128xf32>
    %8 = arith.addf %6, %7 : vector<128x128xf32>
    %9 = arith.truncf %8 : vector<128x128xf32> to vector<128x128xbf16>
    %c0_3 = arith.constant 0 : index
    %c0_4 = arith.constant 0 : index
    %10 = vector.load %arg3[%c0_3, %c0_4] : memref<128x128xbf16, #tpu.memory_space<vmem>>, vector<128x128xbf16>
    tpu.vector_store %arg3[%c0_3, %c0_4], %9 {strides = array<i32>} : memref<128x128xbf16, #tpu.memory_space<vmem>>, vector<128x128xbf16>,
    return
  }
  func.func @transform_0(%arg0: i32, %arg1: i32) -> (i32, i32) {
    %c0_i32 = arith.constant 0 : i32
    return %arg0, %arg1 : i32, i32
  }
  func.func @transform_1(%arg0: i32, %arg1: i32) -> (i32, i32) {
    %c0_i32 = arith.constant 0 : i32
    return %arg0, %arg1 : i32, i32
  }
}

</mosaic_0001>

<bundles_post_ra>
// kernel: tpu_custom_call.1
= control target key start
LH: loop header
LB: loop body
LE: loop exit
PB: predicated region body
PF: predicated region fallthrough
CT: control target
= control target key end

     0   :  { %6 = vsyncpa [#allocation3], 0  ;;  %s557_s0 = inlined_call_operand.hbm [shape: f32[128,128], index: 0, kind: input, shape index: {}]   ;;  %s558_s1 = inlined_call_operand.hbm [shape: bf16[128,128], index: 1, kind: output, shape index: {}]  }
   0x1   :  { %7 = vsyncpa [#allocation4], 0  ;;  %s413_s6 = smov [#allocation2]   ;;  %s365_s10 = scalar_lea.hbm %s557_s0, 2048 }
   0x2   :  { %s13_s7 = sshll.u32 %s413_s6, 4  ;;  %p366_p0 = scmp.ne.s32.totalorder %s557_s0, %s365_s10  ;;  %s14_s7 = int_to_ptr.vmem [resolvable:$true] %s13_s7 }
   0x3   :  { %p369_p1 = scmp.lt.u32.totalorder %s365_s10, %s557_s0 }
   0x5   :  { %p371_p2 = pnand %p369_p1, %p366_p0 }
   0x7   :  { %374 = shalt.err (!%p371_p2)
}
   0x8   :  { %s375_s15 = scalar_lea.vmem %s14_s7, 2048  ;;  %p380_p4 = scmp.lt.s32.totalorder %s14_s7, %s14_s7 }
   0x9   :  { %p376_p3 = scmp.ne.s32.totalorder %s14_s7, %s375_s15  ;;  %p381_p5 = scmp.lt.s32.totalorder %s375_s15, %s375_s15 }
   0xb   :  { %p382_p6 = por %p381_p5, %p380_p4 }
   0xd   :  { %p383_p7 = pnand %p382_p6, %p376_p3 }
   0xf   :  { %386 = shalt.err (!%p383_p7)
}
  0x10   :  { %s414_s16 = smov 128   ;;  %s415_s17 = smov 8  }
  0x11   :  { %19 = dma.hbm_to_vmem [thread:$0]  %s557_s0, 2048, %s14_s7, [#allocation3], %s414_s16, %s414_s16, %s415_s17  }
  0x12   :  { %409 = dma.done.wait [#allocation3], 2048  }
  0x13   :  { %410 = vsyncadd [#allocation3], 4294965248  ;;  %v23_v0 = vld [vmem:[#allocation2] sm:$0xff]  ;;  %v441_v1 = vld [vmem:[#allocation2 + $0x8] sm:$0xff]  ;;  %s416_s0 = smov [#allocation5]  }
  0x14   :  { %v443_v2 = vld [vmem:[#allocation2 + $0x10] sm:$0xff]  ;;  %v55_v3 = vmul.f32 1.442695, %v23_v0  ;;  %v57_v4 = vmul.f32 1.442695, %v441_v1  ;;  %v446_v5 = vld [vmem:[#allocation2 + $0x18] sm:$0xff] }
  0x15   :  { %v59_v6 = vmul.f32 1.442695, %v443_v2  ;;  %v449_v7 = vld [vmem:[#allocation2 + $0x20] sm:$0xff]  ;;  %v451_v8 = vld [vmem:[#allocation2 + $0x28] sm:$0xff]  ;;  %v61_v9 = vmul.f32 1.442695, %v446_v5 }
  0x16   :  { %333 = vpow2.f32 %v55_v3  ;;  %v454_v10 = vld [vmem:[#allocation2 + $0x30] sm:$0xff]  ;;  %v456_v11 = vld [vmem:[#allocation2 + $0x38] sm:$0xff]  ;;  %v63_v12 = vmul.f32 1.442695, %v449_v7  ;;  %v65_v13 = vmul.f32 1.442695, %v451_v8 }
  0x17   :  { %335 = vpow2.f32 %v57_v4  ;;  %v460_v14 = vld [vmem:[#allocation2 + $0x40] sm:$0xff]  ;;  %v67_v15 = vmul.f32 1.442695, %v454_v10  ;;  %v463_v16 = vld [vmem:[#allocation2 + $0x48] sm:$0xff]  ;;  %v69_v17 = vmul.f32 1.442695, %v456_v11 }
  0x18   :  { %337 = vpow2.f32 %v59_v6  ;;  %v466_v18 = vld [vmem:[#allocation2 + $0x50] sm:$0xff]  ;;  %v71_v19 = vmul.f32 1.442695, %v460_v14  ;;  %v469_v20 = vld [vmem:[#allocation2 + $0x58] sm:$0xff]  ;;  %v73_v21 = vmul.f32 1.442695, %v463_v16 }
  0x19   :  { %339 = vpow2.f32 %v61_v9  ;;  %v472_v22 = vld [vmem:[#allocation2 + $0x60] sm:$0xff]  ;;  %v75_v23 = vmul.f32 1.442695, %v466_v18  ;;  %v475_v24 = vld [vmem:[#allocation2 + $0x68] sm:$0xff]  ;;  %vm39_vm0 = vcmp.gt.f32.partialorder %v23_v0, 0.0  ;;  %v478_v26 = vld [vmem:[#allocation2 + $0x70] sm:$0xff] }
  0x1a   :  { %341 = vpow2.f32 %v63_v12  ;;  %v77_v25 = vmul.f32 1.442695, %v469_v20  ;;  %vm40_vm1 = vcmp.gt.f32.partialorder %v441_v1, 0.0  ;;  %vm41_vm2 = vcmp.gt.f32.partialorder %v443_v2, 0.0  ;;  %v483_v28 = vld [vmem:[#allocation2 + $0x78] sm:$0xff]  ;;  %s220_s20 = sshll.u32 %s416_s0, 4  ;;  %s221_s20 = int_to_ptr.vmem [resolvable:$true] %s220_s20 }
  0x1b   :  { %343 = vpow2.f32 %v65_v13  ;;  %v79_v27 = vmul.f32 1.442695, %v472_v22  ;;  %vm42_vm3 = vcmp.gt.f32.partialorder %v446_v5, 0.0  ;;  %vm43_vm4 = vcmp.gt.f32.partialorder %v449_v7, 0.0  ;;  %s387_s21 = scalar_lea.vmem %s221_s20, 1024  ;;  %p392_p9 = scmp.lt.s32.totalorder %s221_s20, %s221_s20 }
  0x1c   :  { %345 = vpow2.f32 %v67_v15  ;;  %v81_v29 = vmul.f32 1.442695, %v475_v24  ;;  %vm44_vm5 = vcmp.gt.f32.partialorder %v451_v8, 0.0  ;;  %vm45_vm6 = vcmp.gt.f32.partialorder %v454_v10, 0.0  ;;  %p388_p8 = scmp.ne.s32.totalorder %s221_s20, %s387_s21  ;;  %p393_p10 = scmp.lt.s32.totalorder %s387_s21, %s387_s21 }
  0x1d   :  { %347 = vpow2.f32 %v69_v17  ;;  %v83_v31 = vmul.f32 1.442695, %v478_v26  ;;  %vm46_vm7 = vcmp.gt.f32.partialorder %v456_v11, 0.0  ;;  %v85_v34 = vmul.f32 1.442695, %v483_v28 }
  0x1e   :  { %349 = vpow2.f32 %v71_v19  ;;  %vm47_vm8 = vcmp.gt.f32.partialorder %v460_v14, 0.0  ;;  %vm48_vm9 = vcmp.gt.f32.partialorder %v463_v16, 0.0  ;;  %vm49_vm10 = vcmp.gt.f32.partialorder %v466_v18, 0.0  ;;  %p394_p11 = por %p393_p10, %p392_p9 }
  0x1f   :  { %351 = vpow2.f32 %v73_v21  ;;  %vm50_vm11 = vcmp.gt.f32.partialorder %v469_v20, 0.0  ;;  %vm51_vm12 = vcmp.gt.f32.partialorder %v472_v22, 0.0  ;;  %vm52_vm13 = vcmp.gt.f32.partialorder %v475_v24, 0.0 }
  0x20   :  { %v334_v30 = vpop.eup %333  ;;  %353 = vpow2.f32 %v75_v23  ;;  %vm53_vm14 = vcmp.gt.f32.partialorder %v478_v26, 0.0  ;;  %vm54_vm15 = vcmp.gt.f32.partialorder %v483_v28, 0.0  ;;  %p395_p12 = pnand %p394_p11, %p388_p8 }
  0x21   :  { %v336_v32 = vpop.eup %335  ;;  %v232_v33 = vadd.f32 -1.0, %v334_v30  ;;  %355 = vpow2.f32 %v77_v25 }
  0x22   :  { %v338_v35 = vpop.eup %337  ;;  %v233_v36 = vadd.f32 -1.0, %v336_v32  ;;  %357 = vpow2.f32 %v79_v27 }
  0x23   :  { %v340_v37 = vpop.eup %339  ;;  %v103_v38 = vsel %vm39_vm0, %v23_v0, %v232_v33  ;;  %v234_v39 = vadd.f32 -1.0, %v338_v35  ;;  %359 = vpow2.f32 %v81_v29 }
  0x24   :  { %v342_v40 = vpop.eup %341  ;;  %v104_v41 = vsel %vm40_vm1, %v441_v1, %v233_v36  ;;  %v119_v42 = vadd.f32 1.0, %v103_v38  ;;  %v235_v43 = vadd.f32 -1.0, %v340_v37  ;;  %361 = vpow2.f32 %v83_v31 }
  0x25   :  { %v344_v44 = vpop.eup %343  ;;  %v120_v45 = vadd.f32 1.0, %v104_v41  ;;  %v105_v46 = vsel %vm41_vm2, %v443_v2, %v234_v39  ;;  %v236_v47 = vadd.f32 -1.0, %v342_v40  ;;  %363 = vpow2.f32 %v85_v34 }
  0x26   :  { %v346_v48 = vpop.eup %345  ;;  %v106_v49 = vsel %vm42_vm3, %v446_v5, %v235_v43  ;;  %v121_v50 = vadd.f32 1.0, %v105_v46  ;;  %v237_v51 = vadd.f32 -1.0, %v344_v44 }
  0x27   :  { %v348_v52 = vpop.eup %347  ;;  %v283_v53 = vpack.c.bf16 %v120_v45, %v119_v42  ;;  %v122_v54 = vadd.f32 1.0, %v106_v49  ;;  %v107_v55 = vsel %vm43_vm4, %v449_v7, %v236_v47  ;;  %v238_v56 = vadd.f32 -1.0, %v346_v48 }
  0x28   :  { %v350_v57 = vpop.eup %349  ;;  %v108_v58 = vsel %vm44_vm5, %v451_v8, %v237_v51  ;;  %v123_v59 = vadd.f32 1.0, %v107_v55  ;;  %v239_v60 = vadd.f32 -1.0, %v348_v52 }
  0x29   :  { %v352_v61 = vpop.eup %351  ;;  %284 = vst [vmem:[#allocation5] sm:$0xff] %v283_v53   ;;  %v288_v62 = vpack.c.bf16 %v122_v54, %v121_v50  ;;  %v124_v63 = vadd.f32 1.0, %v108_v58  ;;  %v109_v0 = vsel %vm45_vm6, %v454_v10, %v238_v56  ;;  %v240_v1 = vadd.f32 -1.0, %v350_v57 }
  0x2a   :  { %v354_v2 = vpop.eup %353  ;;  %v110_v3 = vsel %vm46_vm7, %v456_v11, %v239_v60  ;;  %v125_v4 = vadd.f32 1.0, %v109_v0  ;;  %v241_v5 = vadd.f32 -1.0, %v352_v61 }
  0x2b   :  { %v356_v6 = vpop.eup %355  ;;  %320 = vst [vmem:[#allocation5 + $0x8] sm:$0xff] %v288_v62   ;;  %v293_v7 = vpack.c.bf16 %v124_v63, %v123_v59  ;;  %v126_v8 = vadd.f32 1.0, %v110_v3  ;;  %v111_v9 = vsel %vm47_vm8, %v460_v14, %v240_v1  ;;  %v242_v12 = vadd.f32 -1.0, %v354_v2 }
  0x2c   :  { %v358_v10 = vpop.eup %357  ;;  %v112_v13 = vsel %vm48_vm9, %v463_v16, %v241_v5  ;;  %v127_v15 = vadd.f32 1.0, %v111_v9  ;;  %v243_v11 = vadd.f32 -1.0, %v356_v6 }
  0x2d   :  { %v360_v17 = vpop.eup %359  ;;  %321 = vst [vmem:[#allocation5 + $0x10] sm:$0xff] %v293_v7   ;;  %v298_v19 = vpack.c.bf16 %v126_v8, %v125_v4  ;;  %v128_v21 = vadd.f32 1.0, %v112_v13  ;;  %v113_v23 = vsel %vm49_vm10, %v466_v18, %v242_v12  ;;  %v244_v25 = vadd.f32 -1.0, %v358_v10 }
  0x2e   :  { %v362_v14 = vpop.eup %361  ;;  %v114_v27 = vsel %vm50_vm11, %v469_v20, %v243_v11  ;;  %v129_v29 = vadd.f32 1.0, %v113_v23  ;;  %v245_v16 = vadd.f32 -1.0, %v360_v17 }
  0x2f   :  { %v364_v30 = vpop.eup %363  ;;  %322 = vst [vmem:[#allocation5 + $0x18] sm:$0xff] %v298_v19   ;;  %v303_v31 = vpack.c.bf16 %v128_v21, %v127_v15  ;;  %v130_v32 = vadd.f32 1.0, %v114_v27  ;;  %v115_v33 = vsel %vm51_vm12, %v472_v22, %v244_v25  ;;  %v246_v34 = vadd.f32 -1.0, %v362_v14 }
  0x30   :  { %v116_v18 = vsel %vm52_vm13, %v475_v24, %v245_v16  ;;  %v131_v35 = vadd.f32 1.0, %v115_v33  ;;  %v247_v36 = vadd.f32 -1.0, %v364_v30 }
  0x31   :  { %323 = vst [vmem:[#allocation5 + $0x20] sm:$0xff] %v303_v31   ;;  %v308_v20 = vpack.c.bf16 %v130_v32, %v129_v29  ;;  %v132_v37 = vadd.f32 1.0, %v116_v18  ;;  %v117_v38 = vsel %vm53_vm14, %v478_v26, %v246_v34 }
  0x32   :  { %v118_v39 = vsel %vm54_vm15, %v483_v28, %v247_v36  ;;  %v133_v40 = vadd.f32 1.0, %v117_v38 }
  0x33   :  { %324 = vst [vmem:[#allocation5 + $0x28] sm:$0xff] %v308_v20   ;;  %v313_v22 = vpack.c.bf16 %v132_v37, %v131_v35  ;;  %v134_v41 = vadd.f32 1.0, %v118_v39 }
  0x35   :  { %325 = vst [vmem:[#allocation5 + $0x30] sm:$0xff] %v313_v22   ;;  %v318_v42 = vpack.c.bf16 %v134_v41, %v133_v40 }
  0x37   :  { %326 = vst [vmem:[#allocation5 + $0x38] sm:$0xff] %v318_v42  }
  0x38   :  { %398 = shalt.err (!%p395_p12)
}
  0x39   :  { %s399_s24 = scalar_lea.hbm %s558_s1, 1024 }
  0x3a   :  { %p400_p13 = scmp.ne.s32.totalorder %s558_s1, %s399_s24  ;;  %p403_p0 = scmp.lt.u32.totalorder %s399_s24, %s558_s1 }
  0x3c   :  { %p405_p1 = pnand %p403_p0, %p400_p13 }
  0x3e   :  { %408 = shalt.err (!%p405_p1)
}
  0x3f   :  { %s417_s29 = smov 64   ;;  %s418_s30 = smov 4  }
  0x40   :  { %226 = dma.vmem_to_hbm [thread:$0]  %s221_s20, 1024, %s558_s1, [#allocation4], %s417_s29, %s417_s29, %s418_s30  }
  0x41   :  { %411 = dma.done.wait [#allocation4], 1024  }
  0x42   :  { %412 = vsyncadd [#allocation4], 4294966272 }
  0x43   :  { %230 = vsyncpa [#allocation3], 1 }
  0x44   :  { %231 = vsyncpa [#allocation4], 1 }

</bundles_post_ra>
